<compile_context>
chip_gen: v5e
topology: v5e:2x2
jax: 0.10.0
libtpu: 0.0.40
codegen_flags: <defaults>
</compile_context>

<pallas_src>
import math
import functools

import jax
import jax.numpy as jnp
from jax.experimental import pallas as pl
from jax.experimental.pallas import tpu as pltpu


def _round_up(x, m):
    return ((x + m - 1) // m) * m


def _pick_tile(n_pad, want):
    """Largest multiple of 128 that divides n_pad and is <= want (>= 128)."""
    m = n_pad // 128
    best = 1
    for d in range(1, m + 1):
        if m % d == 0 and 128 * d <= want:
            best = d
    return 128 * best


def _vmem_limit(*nbytes):
    """Scoped-VMEM request: 2x the listed working set, capped at 75% of the
    physical per-core VMEM (leaves compiler scratch headroom on v7x's 64 MiB,
    while still raising v5e's 16 MiB scoped default)."""
    try:
        cap = int(pltpu.get_tpu_info().vmem_capacity_bytes)
    except Exception:  # conservative fallback if the query is unavailable
        cap = 64 * 1024 * 1024
    budget = (cap * 3) // 4
    want = max(32 * 1024 * 1024, 2 * int(sum(nbytes)))
    return int(min(budget, want))


# ---------------------------------------------------------------------------
# Kernel 1: support = X @ W   (row-tiled, fully parallel grid)
# ---------------------------------------------------------------------------
def _support_kernel(x_ref, w_ref, s_ref):
    s_ref[...] = jnp.dot(
        x_ref[...], w_ref[...], preferred_element_type=jnp.float32
    ).astype(s_ref.dtype)


# ---------------------------------------------------------------------------
# Kernel 2: out = adj @ support + bias
#   grid = (row tiles [parallel], K tiles over adj columns [arbitrary])
#   adj is streamed in its HBM dtype and cast to the compute dtype in-kernel.
#   support is either VMEM-resident (sliced with pl.ds) or streamed per K.
#   f32 accumulator scratch per row tile; bias add + store on the last K step.
# ---------------------------------------------------------------------------
def _aggregate_kernel(adj_ref, s_ref, b_ref, o_ref, acc_ref, *, tile_k,
                      resident):
    k = pl.program_id(1)
    if resident:
        off = pl.multiple_of(k * tile_k, tile_k)
        s_tile = s_ref[pl.ds(off, tile_k), :]
    else:
        s_tile = s_ref[...]

    part = jnp.dot(adj_ref[...].astype(s_tile.dtype), s_tile,
                   preferred_element_type=jnp.float32)

    @pl.when(k == 0)
    def _():
        acc_ref[...] = part

    @pl.when(k > 0)
    def _():
        acc_ref[...] += part

    @pl.when(k == pl.num_programs(1) - 1)
    def _():
        o_ref[...] = (acc_ref[...] + b_ref[...]).astype(o_ref.dtype)


@functools.partial(jax.jit, static_argnames=("tile_m", "tile_k", "use_bf16"))
def graph_convolution(x, adj, weight, bias=None, *, tile_m=512, tile_k=512,
                      use_bf16=True):
    """GCN forward: adj @ (x @ weight) + bias."""
    n, f_in = x.shape
    f_out = weight.shape[1]
    assert adj.shape == (n, n)

    out_dtype = x.dtype
    compute_dtype = jnp.bfloat16 if use_bf16 else x.dtype
    csize = jnp.dtype(compute_dtype).itemsize
    osize = jnp.dtype(out_dtype).itemsize
    asize = jnp.dtype(adj.dtype).itemsize

    # Lane-dense feature axis (e.g. f_out=64 -> 128); never pad further.
    f_pad = _round_up(f_out, 128)
    pad_f = f_pad - f_out

    # Pad N to a multiple of 128 only; tiles are divisors of n_pad (no lcm
    # inflation).  Padded rows/cols are zero so the contraction is exact.
    n_pad = _round_up(n, 128)
    pad_n = n_pad - n

    tile_k = _pick_tile(n_pad, tile_k)
    # >=2 row tiles when possible so the "parallel" axis shards across the two
    # TensorCores on v7x.
    tm_cap = n_pad // 2 if n_pad >= 256 else n_pad
    tile_m = _pick_tile(n_pad, min(tile_m, tm_cap))

    # Small operands: pad/cast in the wrapper (cheap).  The big adjacency is
    # NOT cast here -- it is cast in-kernel (saves a full HBM pass over adj).
    x_p = x if pad_n == 0 else jnp.pad(x, ((0, pad_n), (0, 0)))
    x_p = x_p.astype(compute_dtype)
    w_p = weight if pad_f == 0 else jnp.pad(weight, ((0, 0), (0, pad_f)))
    w_p = w_p.astype(compute_dtype)
    adj_p = adj if pad_n == 0 else jnp.pad(adj, ((0, pad_n), (0, pad_n)))
    if bias is None:
        b_p = jnp.zeros((1, f_pad), jnp.float32)
    else:
        b_p = bias.reshape(1, f_out).astype(jnp.float32)
        if pad_f:
            b_p = jnp.pad(b_p, ((0, 0), (0, pad_f)))

    # ---- stage 1: support = X @ W ------------------------------------------
    support = pl.pallas_call(
        _support_kernel,
        out_shape=jax.ShapeDtypeStruct((n_pad, f_pad), compute_dtype),
        grid_spec=pltpu.PrefetchScalarGridSpec(
            num_scalar_prefetch=0,
            grid=(n_pad // tile_m,),
            in_specs=[
                pl.BlockSpec((tile_m, f_in), lambda i: (i, 0)),
                pl.BlockSpec((f_in, f_pad), lambda i: (0, 0)),
            ],
            out_specs=pl.BlockSpec((tile_m, f_pad), lambda i: (i, 0)),
        ),
        compiler_params=pltpu.CompilerParams(
            dimension_semantics=("parallel",),
            vmem_limit_bytes=_vmem_limit(
                2 * tile_m * f_in * csize,
                2 * f_in * f_pad * csize,
                2 * tile_m * f_pad * csize,
            ),
        ),
    )(x_p, w_p)

    # ---- stage 2: out = adj @ support + bias --------------------------------
    # Keep `support` VMEM-resident (single DMA, constant index_map) when it
    # fits comfortably; otherwise stream (tile_k, f_pad) slices per K step.
    support_bytes = n_pad * f_pad * csize
    resident = support_bytes <= 8 * 1024 * 1024
    if resident:
        s_spec = pl.BlockSpec((n_pad, f_pad), lambda i, k: (0, 0))
        s_vmem = 2 * support_bytes
    else:
        s_spec = pl.BlockSpec((tile_k, f_pad), lambda i, k: (k, 0))
        s_vmem = 2 * tile_k * f_pad * csize

    agg_kernel = functools.partial(_aggregate_kernel, tile_k=tile_k,
                                   resident=resident)

    out = pl.pallas_call(
        agg_kernel,
        out_shape=jax.ShapeDtypeStruct((n_pad, f_pad), out_dtype),
        grid_spec=pltpu.PrefetchScalarGridSpec(
            num_scalar_prefetch=0,
            grid=(n_pad // tile_m, n_pad // tile_k),
            in_specs=[
                pl.BlockSpec((tile_m, tile_k), lambda i, k: (i, k)),
                s_spec,
                pl.BlockSpec((1, f_pad), lambda i, k: (0, 0)),
            ],
            out_specs=pl.BlockSpec((tile_m, f_pad), lambda i, k: (i, 0)),
            scratch_shapes=[pltpu.VMEM((tile_m, f_pad), jnp.float32)],
        ),
        compiler_params=pltpu.CompilerParams(
            dimension_semantics=("parallel", "arbitrary"),
            vmem_limit_bytes=_vmem_limit(
                2 * tile_m * tile_k * asize,   # adj tiles (double-buffered)
                tile_m * tile_k * csize,       # in-kernel bf16 cast temp
                s_vmem,                        # support (resident or streamed)
                2 * f_pad * 4,                 # bias
                2 * tile_m * f_pad * osize,    # out tiles
                tile_m * f_pad * 4,            # f32 accumulator scratch
            ),
        ),
    )(adj_p, support, b_p)

    return out[:n, :f_out]


def _reference(x, adj, weight, bias):
    return adj @ (x @ weight) + bias[None, :]


if __name__ == "__main__":
    # Module config: in_features -> out_features, bias=True
    N = 256          # number of graph nodes
    F_IN = 128       # in_features
    F_OUT = 64       # out_features

    key = jax.random.PRNGKey(0)
    kx, kadj, kw, kb = jax.random.split(key, 4)

    # Deterministic parameter init mirroring reset_parameters():
    #   stdv = 1 / sqrt(out_features); uniform(-stdv, stdv)
    stdv = 1.0 / math.sqrt(F_OUT)
    weight = jax.random.uniform(kw, (F_IN, F_OUT), jnp.float32, -stdv, stdv)
    bias = jax.random.uniform(kb, (F_OUT,), jnp.float32, -stdv, stdv)

    # Node features and a (dense) row-normalized adjacency with self-loops.
    x = jax.random.normal(kx, (N, F_IN), jnp.float32)
    a = (jax.random.uniform(kadj, (N, N)) < 0.05).astype(jnp.float32)
    a = a + jnp.eye(N, dtype=jnp.float32)
    adj = a / jnp.sum(a, axis=1, keepdims=True)

    ref = _reference(x, adj, weight, bias)

    # f32 path: tight check of kernel structure / padding / accumulation.
    out_f32 = jax.block_until_ready(
        graph_convolution(x, adj, weight, bias, use_bf16=False))
    assert out_f32.shape == (N, F_OUT)
    assert jnp.allclose(out_f32, ref, atol=1e-4, rtol=1e-4), "f32 mismatch"

    # Default bf16-MXU path: looser tolerance (bf16 inputs, f32 accumulation).
    out_bf16 = jax.block_until_ready(graph_convolution(x, adj, weight, bias))
    assert out_bf16.shape == (N, F_OUT)
    assert jnp.allclose(out_bf16, ref, atol=3e-2, rtol=3e-2), "bf16 mismatch"

    print("KERNEL_OK")
</pallas_src>

<mosaic_0001>
module attributes {stable_mosaic.version = 11 : i64} {
  func.func @_support_kernel(%arg0: i32, %arg1: memref<128x128xf32, #tpu.memory_space<vmem>>, %arg2: memref<128x128xf32, #tpu.memory_space<vmem>>, %arg3: memref<128x128xf32, #tpu.memory_space<vmem>>) attributes {dimension_semantics = [#tpu.dimension_semantics<parallel>], iteration_bounds = array<i64: 2>, scalar_prefetch = 0 : i64, scratch_operands = 0 : i64, tpu.core_type = #tpu.core_type<tc>, window_params = [{transform_indices = @transform_0, window_bounds = array<i64: 128, 128>}, {pipeline_mode = #tpu.pipeline_mode<synchronous>, transform_indices = @transform_1, window_bounds = array<i64: 128, 128>}, {transform_indices = @transform_2, window_bounds = array<i64: 128, 128>}]} {
    %c0 = arith.constant 0 : index
    %c0_0 = arith.constant 0 : index
    %0 = vector.load %arg1[%c0, %c0_0] : memref<128x128xf32, #tpu.memory_space<vmem>>, vector<128x128xf32>
    %c0_1 = arith.constant 0 : index
    %c0_2 = arith.constant 0 : index
    %1 = vector.load %arg2[%c0_1, %c0_2] : memref<128x128xf32, #tpu.memory_space<vmem>>, vector<128x128xf32>
    %cst = arith.constant dense<0.000000e+00> : vector<128x128xf32>
    %2 = tpu.matmul %0, %1, %cst {dimension_numbers = #tpu.dot_dimension_numbers<[1], [0], [0], [1], [0, 0, 1, 1], [], []>} : vector<128x128xf32>, vector<128x128xf32>, vector<128x128xf32> -> vector<128x128xf32>
    %c0_3 = arith.constant 0 : index
    %c0_4 = arith.constant 0 : index
    %3 = vector.load %arg3[%c0_3, %c0_4] : memref<128x128xf32, #tpu.memory_space<vmem>>, vector<128x128xf32>
    tpu.vector_store %arg3[%c0_3, %c0_4], %2 {strides = array<i32>} : memref<128x128xf32, #tpu.memory_space<vmem>>, vector<128x128xf32>,
    return
  }
  func.func @transform_0(%arg0: i32) -> (i32, i32) {
    %c0_i32 = arith.constant 0 : i32
    %c0_i32_0 = arith.constant 0 : i32
    return %arg0, %c0_i32 : i32, i32
  }
  func.func @transform_1(%arg0: i32) -> (i32, i32) {
    %c0_i32 = arith.constant 0 : i32
    %c0_i32_0 = arith.constant 0 : i32
    %c0_i32_1 = arith.constant 0 : i32
    return %c0_i32, %c0_i32_0 : i32, i32
  }
  func.func @transform_2(%arg0: i32) -> (i32, i32) {
    %c0_i32 = arith.constant 0 : i32
    %c0_i32_0 = arith.constant 0 : i32
    return %arg0, %c0_i32 : i32, i32
  }
}

module attributes {stable_mosaic.version = 11 : i64} {
  func.func @_aggregate_kernel(%arg0: i32, %arg1: i32, %arg2: memref<128x256xf32, #tpu.memory_space<vmem>>, %arg3: memref<256x128xf32, #tpu.memory_space<vmem>>, %arg4: memref<1x128xf32, #tpu.memory_space<vmem>>, %arg5: memref<128x128xf32, #tpu.memory_space<vmem>>, %arg6: memref<128x128xf32, #tpu.memory_space<vmem>>) attributes {dimension_semantics = [#tpu.dimension_semantics<parallel>, #tpu.dimension_semantics<arbitrary>], iteration_bounds = array<i64: 2, 1>, scalar_prefetch = 0 : i64, scratch_operands = 1 : i64, tpu.core_type = #tpu.core_type<tc>, window_params = [{transform_indices = @transform_0, window_bounds = array<i64: 128, 256>}, {pipeline_mode = #tpu.pipeline_mode<synchronous>, transform_indices = @transform_1, window_bounds = array<i64: 256, 128>}, {pipeline_mode = #tpu.pipeline_mode<synchronous>, transform_indices = @transform_2, window_bounds = array<i64: 1, 128>}, {transform_indices = @transform_3, window_bounds = array<i64: 128, 128>}]} {
    %c256_i32 = arith.constant 256 : i32
    %0 = arith.muli %arg1, %c256_i32 : i32
    %1 = tpu.assume_multiple %0, 256 : i32
    %2 = arith.index_cast %1 : i32 to index
    %c0 = arith.constant 0 : index
    %3 = vector.load %arg3[%2, %c0] : memref<256x128xf32, #tpu.memory_space<vmem>>, vector<256x128xf32>
    %c0_0 = arith.constant 0 : index
    %c0_1 = arith.constant 0 : index
    %4 = vector.load %arg2[%c0_0, %c0_1] : memref<128x256xf32, #tpu.memory_space<vmem>>, vector<128x256xf32>
    %cst = arith.constant dense<0.000000e+00> : vector<128x128xf32>
    %5 = tpu.matmul %4, %3, %cst {dimension_numbers = #tpu.dot_dimension_numbers<[1], [0], [0], [1], [0, 0, 1, 1], [], []>} : vector<128x256xf32>, vector<256x128xf32>, vector<128x128xf32> -> vector<128x128xf32>
    %c0_i32 = arith.constant 0 : i32
    %6 = arith.cmpi eq, %arg1, %c0_i32 : i32
    %7 = arith.extui %6 : i1 to i32
    %c0_i32_2 = arith.constant 0 : i32
    %8 = arith.cmpi ne, %7, %c0_i32_2 : i32
    scf.if %8 {
      %c0_7 = arith.constant 0 : index
      %c0_8 = arith.constant 0 : index
      %15 = vector.load %arg6[%c0_7, %c0_8] : memref<128x128xf32, #tpu.memory_space<vmem>>, vector<128x128xf32>
      tpu.vector_store %arg6[%c0_7, %c0_8], %5 {strides = array<i32>} : memref<128x128xf32, #tpu.memory_space<vmem>>, vector<128x128xf32>,
    } else {
    }
    %c0_i32_3 = arith.constant 0 : i32
    %9 = arith.cmpi sgt, %arg1, %c0_i32_3 : i32
    %10 = arith.extui %9 : i1 to i32
    %c0_i32_4 = arith.constant 0 : i32
    %11 = arith.cmpi ne, %10, %c0_i32_4 : i32
    scf.if %11 {
      %c0_7 = arith.constant 0 : index
      %c0_8 = arith.constant 0 : index
      %15 = vector.load %arg6[%c0_7, %c0_8] : memref<128x128xf32, #tpu.memory_space<vmem>>, vector<128x128xf32>
      %16 = arith.addf %15, %5 : vector<128x128xf32>
      %c0_9 = arith.constant 0 : index
      %c0_10 = arith.constant 0 : index
      %17 = vector.load %arg6[%c0_9, %c0_10] : memref<128x128xf32, #tpu.memory_space<vmem>>, vector<128x128xf32>
      tpu.vector_store %arg6[%c0_9, %c0_10], %16 {strides = array<i32>} : memref<128x128xf32, #tpu.memory_space<vmem>>, vector<128x128xf32>,
    } else {
    }
    %c0_i32_5 = arith.constant 0 : i32
    %12 = arith.cmpi eq, %arg1, %c0_i32_5 : i32
    %13 = arith.extui %12 : i1 to i32
    %c0_i32_6 = arith.constant 0 : i32
    %14 = arith.cmpi ne, %13, %c0_i32_6 : i32
    scf.if %14 {
      %c0_7 = arith.constant 0 : index
      %c0_8 = arith.constant 0 : index
      %15 = vector.load %arg6[%c0_7, %c0_8] : memref<128x128xf32, #tpu.memory_space<vmem>>, vector<128x128xf32>
      %c0_9 = arith.constant 0 : index
      %c0_10 = arith.constant 0 : index
      %16 = vector.load %arg4[%c0_9, %c0_10] : memref<1x128xf32, #tpu.memory_space<vmem>>, vector<1x128xf32>
      %17 = vector.broadcast %16 : vector<1x128xf32> to vector<128x128xf32>
      %18 = arith.addf %15, %17 : vector<128x128xf32>
      %c0_11 = arith.constant 0 : index
      %c0_12 = arith.constant 0 : index
      %19 = vector.load %arg5[%c0_11, %c0_12] : memref<128x128xf32, #tpu.memory_space<vmem>>, vector<128x128xf32>
      tpu.vector_store %arg5[%c0_11, %c0_12], %18 {strides = array<i32>} : memref<128x128xf32, #tpu.memory_space<vmem>>, vector<128x128xf32>,
    } else {
    }
    return
  }
  func.func @transform_0(%arg0: i32, %arg1: i32) -> (i32, i32) {
    %c0_i32 = arith.constant 0 : i32
    return %arg0, %arg1 : i32, i32
  }
  func.func @transform_1(%arg0: i32, %arg1: i32) -> (i32, i32) {
    %c0_i32 = arith.constant 0 : i32
    %c0_i32_0 = arith.constant 0 : i32
    %c0_i32_1 = arith.constant 0 : i32
    return %c0_i32, %c0_i32_0 : i32, i32
  }
  func.func @transform_2(%arg0: i32, %arg1: i32) -> (i32, i32) {
    %c0_i32 = arith.constant 0 : i32
    %c0_i32_0 = arith.constant 0 : i32
    %c0_i32_1 = arith.constant 0 : i32
    return %c0_i32, %c0_i32_0 : i32, i32
  }
  func.func @transform_3(%arg0: i32, %arg1: i32) -> (i32, i32) {
    %c0_i32 = arith.constant 0 : i32
    %c0_i32_0 = arith.constant 0 : i32
    return %arg0, %c0_i32 : i32, i32
  }
}

</mosaic_0001>

<bundles_post_ra>
// kernel: graph_convolution.2
= control target key start
LH: loop header
LB: loop body
LE: loop exit
PB: predicated region body
PF: predicated region fallthrough
CT: control target
= control target key end

     0   :  { %s406_s9 = smov 0   ;;  %s516_s0 = inlined_call_operand.vmem [shape: f32[256,128], index: 0, kind: input, shape index: {}]   ;;  %s517_s1 = inlined_call_operand.vmem [shape: f32[128,128], index: 1, kind: input, shape index: {}]   ;;  %s518_s2 = inlined_call_operand.vmem [shape: f32[256,128], index: 2, kind: output, shape index: {}]  }
   0x1 LB: > { %s316_s10 = sadd.s32 4294967295, %s389_s9   ;;  %p320_p0 = scmp.ge.s32.totalorder %s389_s9, 1  ;;  %s389_s9 = sphi %s406_s9, %s12_s9  }
   0x2   : > { %p113_p1 = scmp.lt.s32.totalorder %s389_s9, 3 }
   0x4   : > { %p114_p2 = pnand %p320_p0, %p113_p1 }
   0x5   : > { %s321_s27 = sshll.u32 (!%p114_p2), %s316_s10, 4 }
   0x6   : > { %117 = sbr.rel (%p114_p2) target bundleno = 201 (0xc9), region = 28  ;;  %p136_p3 = scmp.lt.s32.totalorder (!%p114_p2), %s321_s27, 31 }
   0xb   : > { %v178_v0 = vld [vmem:[%s517_s1 + $0x78] sm:$0xff]  ;;  %v177_v1 = vld [vmem:[%s517_s1 + $0x70] sm:$0xff]  ;;  %v176_v2 = vld [vmem:[%s517_s1 + $0x68] sm:$0xff]  ;;  %s520_s27 = smov (!%p136_p3, %s321_s27), 31 }
   0xc   : > { %328 = vmatpush.msra.mxu2 %v178_v0  ;;  %329 = vmatpush.msra.mxu3 %v178_v0  ;;  %v175_v3 = vld [vmem:[%s517_s1 + $0x60] sm:$0xff]  ;;  %v174_v4 = vld [vmem:[%s517_s1 + $0x58] sm:$0xff]  ;;  %v173_v5 = vld [vmem:[%s517_s1 + $0x50] sm:$0xff]  ;;  %s322_s11 = sshll.u32 %s520_s27, 3 }
   0xd   : > { %179 = vmatpush.msra.mxu0 %v178_v0  ;;  %327 = vmatpush.msra.mxu1 %v178_v0  ;;  %v172_v6 = vld [vmem:[%s517_s1 + $0x48] sm:$0xff]  ;;  %v171_v7 = vld [vmem:[%s517_s1 + $0x40] sm:$0xff]  ;;  %v170_v8 = vld [vmem:[%s517_s1 + $0x38] sm:$0xff]  ;;  %s469_s18 = scalar_lea.vmem %s516_s0, %s322_s11  ;;  %s495_s23 = scalar_lea.vmem %s518_s2, %s322_s11 }
   0xe   : > { %331 = vmatpush.msra.mxu2 %v177_v1  ;;  %332 = vmatpush.msra.mxu3 %v177_v1  ;;  %v169_v9 = vld [vmem:[%s517_s1 + $0x30] sm:$0xff]  ;;  %v168_v10 = vld [vmem:[%s517_s1 + $0x28] sm:$0xff]  ;;  %v167_v11 = vld [vmem:[%s517_s1 + $0x20] sm:$0xff] }
   0xf   : > { %180 = vmatpush.msra.mxu0 %v177_v1  ;;  %330 = vmatpush.msra.mxu1 %v177_v1  ;;  %v166_v12 = vld [vmem:[%s517_s1 + $0x18] sm:$0xff]  ;;  %v165_v13 = vld [vmem:[%s517_s1 + $0x10] sm:$0xff]  ;;  %v164_v14 = vld [vmem:[%s517_s1 + $0x8] sm:$0xff] }
  0x10   : > { %334 = vmatpush.msra.mxu2 %v176_v2  ;;  %335 = vmatpush.msra.mxu3 %v176_v2  ;;  %v163_v15 = vld [vmem:[%s517_s1] sm:$0xff]  ;;  %v156_v20 = vld [vmem:[%s469_s18 + $0x48] sm:$0xff]  ;;  %v157_v24 = vld [vmem:[%s469_s18 + $0x50] sm:$0xff] }
  0x11   : > { %181 = vmatpush.msra.mxu0 %v176_v2  ;;  %333 = vmatpush.msra.mxu1 %v176_v2  ;;  %v155_v16 = vld [vmem:[%s469_s18 + $0x40] sm:$0xff]  ;;  %v160_v21 = vld [vmem:[%s469_s18 + $0x68] sm:$0xff]  ;;  %v161_v25 = vld [vmem:[%s469_s18 + $0x70] sm:$0xff] }
  0x12   : > { %337 = vmatpush.msra.mxu2 %v175_v3  ;;  %338 = vmatpush.msra.mxu3 %v175_v3  ;;  %v159_v17 = vld [vmem:[%s469_s18 + $0x60] sm:$0xff]  ;;  %v148_v22 = vld [vmem:[%s469_s18 + $0x8] sm:$0xff]  ;;  %v149_v26 = vld [vmem:[%s469_s18 + $0x10] sm:$0xff] }
  0x13   : > { %182 = vmatpush.msra.mxu0 %v175_v3  ;;  %336 = vmatpush.msra.mxu1 %v175_v3  ;;  %v147_v18 = vld [vmem:[%s469_s18] sm:$0xff]  ;;  %v152_v23 = vld [vmem:[%s469_s18 + $0x28] sm:$0xff]  ;;  %v153_v27 = vld [vmem:[%s469_s18 + $0x30] sm:$0xff] }
  0x14   : > { %340 = vmatpush.msra.mxu2 %v174_v4  ;;  %341 = vmatpush.msra.mxu3 %v174_v4  ;;  %v151_v19 = vld [vmem:[%s469_s18 + $0x20] sm:$0xff]  ;;  %v158_v28 = vld [vmem:[%s469_s18 + $0x58] sm:$0xff] }
  0x15   : > { %183 = vmatpush.msra.mxu0 %v174_v4  ;;  %339 = vmatpush.msra.mxu1 %v174_v4  ;;  %v162_v29 = vld [vmem:[%s469_s18 + $0x78] sm:$0xff] }
  0x16   : > { %343 = vmatpush.msra.mxu2 %v173_v5  ;;  %344 = vmatpush.msra.mxu3 %v173_v5  ;;  %v150_v30 = vld [vmem:[%s469_s18 + $0x18] sm:$0xff] }
  0x17   : > { %184 = vmatpush.msra.mxu0 %v173_v5  ;;  %342 = vmatpush.msra.mxu1 %v173_v5  ;;  %v154_v31 = vld [vmem:[%s469_s18 + $0x38] sm:$0xff] }
  0x18   : > { %346 = vmatpush.msra.mxu2 %v172_v6  ;;  %347 = vmatpush.msra.mxu3 %v172_v6 }
  0x19   : > { %185 = vmatpush.msra.mxu0 %v172_v6  ;;  %345 = vmatpush.msra.mxu1 %v172_v6 }
  0x1a   : > { %349 = vmatpush.msra.mxu2 %v171_v7  ;;  %350 = vmatpush.msra.mxu3 %v171_v7 }
  0x1b   : > { %186 = vmatpush.msra.mxu0 %v171_v7  ;;  %348 = vmatpush.msra.mxu1 %v171_v7 }
  0x1c   : > { %352 = vmatpush.msra.mxu2 %v170_v8  ;;  %353 = vmatpush.msra.mxu3 %v170_v8 }
  0x1d   : > { %187 = vmatpush.msra.mxu0 %v170_v8  ;;  %351 = vmatpush.msra.mxu1 %v170_v8 }
  0x1e   : > { %355 = vmatpush.msra.mxu2 %v169_v9  ;;  %356 = vmatpush.msra.mxu3 %v169_v9 }
  0x1f   : > { %188 = vmatpush.msra.mxu0 %v169_v9  ;;  %354 = vmatpush.msra.mxu1 %v169_v9 }
  0x20   : > { %358 = vmatpush.msra.mxu2 %v168_v10  ;;  %359 = vmatpush.msra.mxu3 %v168_v10 }
  0x21   : > { %189 = vmatpush.msra.mxu0 %v168_v10  ;;  %357 = vmatpush.msra.mxu1 %v168_v10 }
  0x22   : > { %361 = vmatpush.msra.mxu2 %v167_v11  ;;  %362 = vmatpush.msra.mxu3 %v167_v11 }
  0x23   : > { %190 = vmatpush.msra.mxu0 %v167_v11  ;;  %360 = vmatpush.msra.mxu1 %v167_v11 }
  0x24   : > { %364 = vmatpush.msra.mxu2 %v166_v12  ;;  %365 = vmatpush.msra.mxu3 %v166_v12 }
  0x25   : > { %191 = vmatpush.msra.mxu0 %v166_v12  ;;  %363 = vmatpush.msra.mxu1 %v166_v12 }
  0x26   : > { %367 = vmatpush.msra.mxu2 %v165_v13  ;;  %368 = vmatpush.msra.mxu3 %v165_v13 }
  0x27   : > { %192 = vmatpush.msra.mxu0 %v165_v13  ;;  %366 = vmatpush.msra.mxu1 %v165_v13 }
  0x28   : > { %370 = vmatpush.msra.mxu2 %v164_v14  ;;  %371 = vmatpush.msra.mxu3 %v164_v14 }
  0x29   : > { %193 = vmatpush.msra.mxu0 %v164_v14  ;;  %369 = vmatpush.msra.mxu1 %v164_v14 }
  0x2a   : > { %373 = vmatpush.msra.mxu2 %v163_v15  ;;  %374 = vmatpush.msra.mxu3 %v163_v15 }
  0x2b   : > { %219 = vmatmul.f32.vlgmr.msra.gmra.mxu2 %v155_v16  ;;  %231 = vmatmul.f32.vlgmr.msra.gmra.mxu3 %v159_v17 }
  0x2c   : > { %194 = vmatpush.msra.mxu0 %v163_v15  ;;  %372 = vmatpush.msra.mxu1 %v163_v15 }
  0x2d   : > { %195 = vmatmul.f32.vlgmr.msra.gmra.mxu0 %v147_v18  ;;  %207 = vmatmul.f32.vlgmr.msra.gmra.mxu1 %v151_v19 }
  0x33   : > { %222 = vmatmul.f32.gmra.mxu2 %v156_v20  ;;  %234 = vmatmul.f32.gmra.mxu3 %v160_v21 }
  0x35   : > { %198 = vmatmul.f32.gmra.mxu0 %v148_v22  ;;  %210 = vmatmul.f32.gmra.mxu1 %v152_v23 }
  0x3b   : > { %225 = vmatmul.f32.gmra.mxu2 %v157_v24  ;;  %237 = vmatmul.f32.gmra.mxu3 %v161_v25 }
  0x3d   : > { %201 = vmatmul.f32.gmra.mxu0 %v149_v26  ;;  %213 = vmatmul.f32.gmra.mxu1 %v153_v27 }
  0x43   : > { %228 = vmatmul.f32.gmra.mxu2 %v158_v28  ;;  %240 = vmatmul.f32.gmra.mxu3 %v162_v29 }
  0x45   : > { %204 = vmatmul.f32.gmra.mxu0 %v150_v30  ;;  %216 = vmatmul.f32.gmra.mxu1 %v154_v31 }
  0xaa   : > { %v196_v32 = vpop.f32.mrf.mxu0  ;;  %v208_v33 = vpop.f32.mrf.mxu1 }
  0xab   : > { %244 = vst [vmem:[%s495_s23] sm:$0xff] %v196_v32 }
  0xac   : > { %248 = vst [vmem:[%s495_s23 + $0x20] sm:$0xff] %v208_v33 }
  0xae   : > { %v220_v34 = vpop.f32.mrf.mxu2  ;;  %v232_v35 = vpop.f32.mrf.mxu3 }
  0xaf   : > { %252 = vst [vmem:[%s495_s23 + $0x40] sm:$0xff] %v220_v34 }
  0xb0   : > { %256 = vst [vmem:[%s495_s23 + $0x60] sm:$0xff] %v232_v35 }
  0xb2   : > { %v199_v36 = vpop.f32.mrf.mxu0  ;;  %v211_v37 = vpop.f32.mrf.mxu1 }
  0xb3   : > { %245 = vst [vmem:[%s495_s23 + $0x8] sm:$0xff] %v199_v36 }
  0xb4   : > { %249 = vst [vmem:[%s495_s23 + $0x28] sm:$0xff] %v211_v37 }
  0xb6   : > { %v223_v38 = vpop.f32.mrf.mxu2  ;;  %v235_v39 = vpop.f32.mrf.mxu3 }
  0xb7   : > { %253 = vst [vmem:[%s495_s23 + $0x48] sm:$0xff] %v223_v38 }
  0xb8   : > { %257 = vst [vmem:[%s495_s23 + $0x68] sm:$0xff] %v235_v39 }
  0xba   : > { %v202_v40 = vpop.f32.mrf.mxu0  ;;  %v214_v41 = vpop.f32.mrf.mxu1 }
  0xbb   : > { %246 = vst [vmem:[%s495_s23 + $0x10] sm:$0xff] %v202_v40 }
  0xbc   : > { %250 = vst [vmem:[%s495_s23 + $0x30] sm:$0xff] %v214_v41 }
  0xbe   : > { %v226_v42 = vpop.f32.mrf.mxu2  ;;  %v238_v43 = vpop.f32.mrf.mxu3 }
  0xbf   : > { %254 = vst [vmem:[%s495_s23 + $0x50] sm:$0xff] %v226_v42 }
  0xc0   : > { %258 = vst [vmem:[%s495_s23 + $0x70] sm:$0xff] %v238_v43 }
  0xc2   : > { %v205_v44 = vpop.f32.mrf.mxu0  ;;  %v217_v45 = vpop.f32.mrf.mxu1 }
  0xc3   : > { %247 = vst [vmem:[%s495_s23 + $0x18] sm:$0xff] %v205_v44 }
  0xc4   : > { %251 = vst [vmem:[%s495_s23 + $0x38] sm:$0xff] %v217_v45 }
  0xc6   : > { %v229_v46 = vpop.f32.mrf.mxu2  ;;  %v241_v47 = vpop.f32.mrf.mxu3 }
  0xc7   : > { %255 = vst [vmem:[%s495_s23 + $0x58] sm:$0xff] %v229_v46 }
  0xc8   : > { %259 = vst [vmem:[%s495_s23 + $0x78] sm:$0xff] %v241_v47 }
  0xc9 PF: > { %s12_s9 = sadd.s32 1, %s389_s9  }
  0xca   : > { %p9_p4 = scmp.ge.s32.totalorder %s12_s9, 4  }
  0xcc   :  { %11 = sbr.rel (!%p9_p4) target bundleno = 1 (0x1), region = 58 }

// kernel: graph_convolution.3
= control target key start
LH: loop header
LB: loop body
LE: loop exit
PB: predicated region body
PF: predicated region fallthrough
CT: control target
= control target key end

     0   :  { %8 = vsyncpa [#allocation4], 0  ;;  %s1083_s0 = inlined_call_operand.hbm [shape: f32[256,256], index: 0, kind: input, shape index: {}]   ;;  %s1084_s1 = inlined_call_operand.vmem [shape: f32[256,128], index: 1, kind: input, shape index: {}]   ;;  %s1085_s2 = inlined_call_operand.vmem [shape: f32[1,128], index: 2, kind: input, shape index: {}]   ;;  %s1086_s3 = inlined_call_operand.vmem [shape: f32[256,128], index: 3, kind: output, shape index: {}]  }
   0x1   :  { %10 = vsyncpa [#allocation4 + $0x1], 0  ;;  %s827_s12 = smov 0   ;;  %s829_s13 = smov 0  }
   0x2   :  { %s831_s14 = smov 0   ;;  %s833_s15 = smov 0  }
   0x3   :  { %s835_s16 = smov 0   ;;  %s837_s17 = smov 0  }
   0x4 LB: > { %s617_s18 = sadd.s32 4294967295, %s803_s17   ;;  %s28_s19 = sadd.s32 1, %s799_s16  ;;  %s803_s17 = sphi %s837_s17, %s16_s17   ;;  %s799_s16 = sphi %s835_s16, %s1093_s16   ;;  %s795_s15 = sphi %s833_s15, %s1092_s15   ;;  %s791_s14 = sphi %s831_s14, %s1091_s14   ;;  %s787_s13 = sphi %s829_s13, %s1090_s13   ;;  %s783_s12 = sphi %s827_s12, %s1089_s12  }
   0x5   : > { %p30_p0 = scmp.ge.s32.totalorder %s28_s19, 2  ;;  %s37_s20 = sadd.s32 1, %s791_s14 }
   0x6   : > { %p44_p1 = scmp.ne.s32.totalorder %s791_s14, %s787_s13  ;;  %p45_p2 = scmp.eq.s32.totalorder %s803_s17, 0 }
   0x7   : > { %s1095_s19 = smov (%p30_p0, %s28_s19), 0  ;;  %p50_p4 = scmp.ne.s32.totalorder %s787_s13, %s783_s12 }
   0x8   : > { %p863_p3 = por %p45_p2, %p44_p1  ;;  %s32_s22 = ssub.s32 %s799_s16, %s1095_s19 }
   0x9   : > { %p51_p5 = scmp.eq.s32.totalorder %s617_s18, 0  ;;  %p35_p6 = scmp.eq.s32.totalorder %s32_s22, 0 }
   0xa   : > { %p671_p8 = scmp.lt.s32.totalorder %s803_s17, 2  ;;  %s148_s25 = sand.u32 1, %s791_s14  }
   0xb   : > { %p870_p7 = por %p51_p5, %p50_p4  ;;  %s632_s26 = sshll.u32 %s799_s16, 8 }
   0xc   : > { %s876_s24 = scalar_select %p35_p6, %s791_s14, %s37_s20  }
   0xd   : > { %s621_s27 = sshll.u32 %s148_s25, 8  ;;  %s160_s30 = scalar_lea.hbm %s1083_s0, %s632_s26 }
   0xe   : > { %s161_s4 = sshll.u32 %s160_s30, 4  ;;  %s152_s5 = scalar_lea.vmem [#allocation3], %s621_s27  ;;  %s162_s4 = int_to_ptr.hbm [resolvable:$true] %s161_s4 }
   0xf   : > { %s163_s6 = sshll.u32 %s152_s5, 4  ;;  %p668_p9 = pnand %p671_p8, %p863_p3  ;;  %s164_s6 = int_to_ptr.vmem [resolvable:$true] %s163_s6 }
  0x10   : > { %p625_p10 = scmp.ge.s32.totalorder %s803_s17, 1  ;;  %p171_p11 = scmp.lt.s32.totalorder %s803_s17, 3 }
  0x11   : > { %s149_s7 = scalar_lea.sflag [#allocation4], %s148_s25  ;;  %s805_s8 = smov 256  }
  0x12   : > { %s806_s9 = smov 16   ;;  %p172_p12 = pnand %p625_p10, %p171_p11 }
  0x13   : > { %670 = dma.hbm_to_vmem [thread:$0]  (!%p668_p9), %s162_s4, 4096, %s164_s6, %s149_s7, %s805_s8, %s805_s8, %s806_s9  }
  0x14   : > { %175 = sbr.rel (%p172_p12) target bundleno = 252 (0xfc), region = 32  ;;  %s177_s10 = sand.u32 (!%p172_p12), 1, %s787_s13  }
  0x15   : > { %s626_s11 = sshll.u32 (!%p172_p12), %s177_s10, 8  ;;  %s178_s12 = scalar_lea.sflag (!%p172_p12), [#allocation4], %s177_s10 }
  0x16   : > { %s888_s18 = scalar_lea.vmem (!%p172_p12), [#allocation3], %s626_s11 }
  0x19   : > { %778 = dma.done.wait (%p870_p7), %s178_s12, 4096  }
  0x1a   : > { %780 = vsyncadd (%p870_p7), %s178_s12, 4294963200  ;;  %v230_v0 = vld [vmem:[%s1084_s1 + $0x78] sm:$0xff]  ;;  %v229_v2 = vld [vmem:[%s1084_s1 + $0x70] sm:$0xff]  ;;  %s627_s29 = sshll.u32 %s795_s15, 4 }
  0x1b   : > { %v246_v1 = vld [vmem:[%s1084_s1 + $0xf8] sm:$0xff]  ;;  %633 = vmatpush.msra.mxu2 %v230_v0  ;;  %v245_v3 = vld [vmem:[%s1084_s1 + $0xf0] sm:$0xff]  ;;  %v228_v4 = vld [vmem:[%s1084_s1 + $0x68] sm:$0xff]  ;;  %279 = vmatpush.msra.mxu0 %v230_v0  ;;  %p208_p13 = scmp.lt.s32.totalorder %s627_s29, 31 }
  0x1c   : > { %649 = vmatpush.msra.mxu3 %v246_v1  ;;  %v244_v5 = vld [vmem:[%s1084_s1 + $0xe8] sm:$0xff]  ;;  %344 = vmatpush.msra.mxu1 %v246_v1  ;;  %v227_v6 = vld [vmem:[%s1084_s1 + $0x60] sm:$0xff]  ;;  %v226_v8 = vld [vmem:[%s1084_s1 + $0x58] sm:$0xff] }
  0x1d   : > { %634 = vmatpush.msra.mxu2 %v229_v2  ;;  %v243_v7 = vld [vmem:[%s1084_s1 + $0xe0] sm:$0xff]  ;;  %280 = vmatpush.msra.mxu0 %v229_v2  ;;  %v242_v9 = vld [vmem:[%s1084_s1 + $0xd8] sm:$0xff]  ;;  %v225_v10 = vld [vmem:[%s1084_s1 + $0x50] sm:$0xff]  ;;  %s1097_s29 = smov (!%p208_p13, %s627_s29), 31 }
  0x1e   : > { %650 = vmatpush.msra.mxu3 %v245_v3  ;;  %345 = vmatpush.msra.mxu1 %v245_v3  ;;  %v241_v11 = vld [vmem:[%s1084_s1 + $0xd0] sm:$0xff]  ;;  %v224_v12 = vld [vmem:[%s1084_s1 + $0x48] sm:$0xff]  ;;  %v223_v14 = vld [vmem:[%s1084_s1 + $0x40] sm:$0xff]  ;;  %s628_s23 = sshll.u32 %s1097_s29, 3 }
  0x1f   : > { %635 = vmatpush.msra.mxu2 %v228_v4  ;;  %281 = vmatpush.msra.mxu0 %v228_v4  ;;  %v240_v13 = vld [vmem:[%s1084_s1 + $0xc8] sm:$0xff]  ;;  %v239_v15 = vld [vmem:[%s1084_s1 + $0xc0] sm:$0xff]  ;;  %v222_v16 = vld [vmem:[%s1084_s1 + $0x38] sm:$0xff] }
  0x20   : > { %651 = vmatpush.msra.mxu3 %v244_v5  ;;  %346 = vmatpush.msra.mxu1 %v244_v5  ;;  %v238_v17 = vld [vmem:[%s1084_s1 + $0xb8] sm:$0xff]  ;;  %v221_v18 = vld [vmem:[%s1084_s1 + $0x30] sm:$0xff]  ;;  %v220_v20 = vld [vmem:[%s1084_s1 + $0x28] sm:$0xff] }
  0x21   : > { %636 = vmatpush.msra.mxu2 %v227_v6  ;;  %282 = vmatpush.msra.mxu0 %v227_v6  ;;  %v237_v19 = vld [vmem:[%s1084_s1 + $0xb0] sm:$0xff]  ;;  %v236_v21 = vld [vmem:[%s1084_s1 + $0xa8] sm:$0xff]  ;;  %v219_v22 = vld [vmem:[%s1084_s1 + $0x20] sm:$0xff] }
  0x22   : > { %652 = vmatpush.msra.mxu3 %v243_v7  ;;  %347 = vmatpush.msra.mxu1 %v243_v7  ;;  %v235_v23 = vld [vmem:[%s1084_s1 + $0xa0] sm:$0xff]  ;;  %v218_v24 = vld [vmem:[%s1084_s1 + $0x18] sm:$0xff]  ;;  %v217_v26 = vld [vmem:[%s1084_s1 + $0x10] sm:$0xff] }
  0x23   : > { %637 = vmatpush.msra.mxu2 %v226_v8  ;;  %283 = vmatpush.msra.mxu0 %v226_v8  ;;  %v234_v25 = vld [vmem:[%s1084_s1 + $0x98] sm:$0xff]  ;;  %v233_v27 = vld [vmem:[%s1084_s1 + $0x90] sm:$0xff]  ;;  %v216_v28 = vld [vmem:[%s1084_s1 + $0x8] sm:$0xff] }
  0x24   : > { %653 = vmatpush.msra.mxu3 %v242_v9  ;;  %348 = vmatpush.msra.mxu1 %v242_v9  ;;  %v232_v29 = vld [vmem:[%s1084_s1 + $0x88] sm:$0xff]  ;;  %v215_v30 = vld [vmem:[%s1084_s1] sm:$0xff]  ;;  %v265_v36 = vld [vmem:[%s888_s18 + $0x90] sm:$0xff] }
  0x25   : > { %638 = vmatpush.msra.mxu2 %v225_v10  ;;  %284 = vmatpush.msra.mxu0 %v225_v10  ;;  %v231_v31 = vld [vmem:[%s1084_s1 + $0x80] sm:$0xff]  ;;  %v264_v33 = vld [vmem:[%s888_s18 + $0x88] sm:$0xff]  ;;  %v266_v37 = vld [vmem:[%s888_s18 + $0x98] sm:$0xff] }
  0x26   : > { %654 = vmatpush.msra.mxu3 %v241_v11  ;;  %349 = vmatpush.msra.mxu1 %v241_v11  ;;  %v263_v32 = vld [vmem:[%s888_s18 + $0x80] sm:$0xff]  ;;  %v248_v35 = vld [vmem:[%s888_s18 + $0x8] sm:$0xff]  ;;  %v249_v38 = vld [vmem:[%s888_s18 + $0x10] sm:$0xff] }
  0x27   : > { %639 = vmatpush.msra.mxu2 %v224_v12  ;;  %285 = vmatpush.msra.mxu0 %v224_v12  ;;  %v247_v34 = vld [vmem:[%s888_s18] sm:$0xff]  ;;  %v250_v39 = vld [vmem:[%s888_s18 + $0x18] sm:$0xff]  ;;  %v268_v41 = vld [vmem:[%s888_s18 + $0xa8] sm:$0xff] }
  0x28   : > { %655 = vmatpush.msra.mxu3 %v240_v13  ;;  %350 = vmatpush.msra.mxu1 %v240_v13  ;;  %v267_v40 = vld [vmem:[%s888_s18 + $0xa0] sm:$0xff]  ;;  %v252_v43 = vld [vmem:[%s888_s18 + $0x28] sm:$0xff]  ;;  %v269_v44 = vld [vmem:[%s888_s18 + $0xb0] sm:$0xff] }
  0x29   : > { %640 = vmatpush.msra.mxu2 %v223_v14  ;;  %286 = vmatpush.msra.mxu0 %v223_v14  ;;  %v251_v42 = vld [vmem:[%s888_s18 + $0x20] sm:$0xff]  ;;  %v270_v45 = vld [vmem:[%s888_s18 + $0xb8] sm:$0xff]  ;;  %v253_v46 = vld [vmem:[%s888_s18 + $0x30] sm:$0xff] }
  0x2a   : > { %656 = vmatpush.msra.mxu3 %v239_v15  ;;  %351 = vmatpush.msra.mxu1 %v239_v15  ;;  %v254_v47 = vld [vmem:[%s888_s18 + $0x38] sm:$0xff]  ;;  %v271_v48 = vld [vmem:[%s888_s18 + $0xc0] sm:$0xff]  ;;  %v272_v49 = vld [vmem:[%s888_s18 + $0xc8] sm:$0xff] }
  0x2b   : > { %641 = vmatpush.msra.mxu2 %v222_v16  ;;  %287 = vmatpush.msra.mxu0 %v222_v16  ;;  %v255_v50 = vld [vmem:[%s888_s18 + $0x40] sm:$0xff]  ;;  %v256_v51 = vld [vmem:[%s888_s18 + $0x48] sm:$0xff]  ;;  %v273_v52 = vld [vmem:[%s888_s18 + $0xd0] sm:$0xff] }
  0x2c   : > { %657 = vmatpush.msra.mxu3 %v238_v17  ;;  %352 = vmatpush.msra.mxu1 %v238_v17  ;;  %v274_v53 = vld [vmem:[%s888_s18 + $0xd8] sm:$0xff]  ;;  %v257_v54 = vld [vmem:[%s888_s18 + $0x50] sm:$0xff]  ;;  %v275_v56 = vld [vmem:[%s888_s18 + $0xe0] sm:$0xff] }
  0x2d   : > { %642 = vmatpush.msra.mxu2 %v221_v18  ;;  %288 = vmatpush.msra.mxu0 %v221_v18  ;;  %v258_v55 = vld [vmem:[%s888_s18 + $0x58] sm:$0xff]  ;;  %v276_v57 = vld [vmem:[%s888_s18 + $0xe8] sm:$0xff]  ;;  %v259_v58 = vld [vmem:[%s888_s18 + $0x60] sm:$0xff] }
  0x2e   : > { %658 = vmatpush.msra.mxu3 %v237_v19  ;;  %353 = vmatpush.msra.mxu1 %v237_v19  ;;  %v260_v59 = vld [vmem:[%s888_s18 + $0x68] sm:$0xff]  ;;  %v277_v60 = vld [vmem:[%s888_s18 + $0xf0] sm:$0xff]  ;;  %v278_v61 = vld [vmem:[%s888_s18 + $0xf8] sm:$0xff] }
  0x2f   : > { %643 = vmatpush.msra.mxu2 %v220_v20  ;;  %289 = vmatpush.msra.mxu0 %v220_v20  ;;  %v261_v62 = vld [vmem:[%s888_s18 + $0x70] sm:$0xff]  ;;  %v262_v63 = vld [vmem:[%s888_s18 + $0x78] sm:$0xff]  ;;  %v1026_v0 = vld [vmem:[%s1085_s2] ss:$0 sm:$0xff]  ;;  %s1031_s18 = scalar_lea.vmem %s1086_s3, %s628_s23 }
  0x30   : > { %659 = vmatpush.msra.mxu3 %v236_v21  ;;  %354 = vmatpush.msra.mxu1 %v236_v21 }
  0x31   : > { %644 = vmatpush.msra.mxu2 %v219_v22  ;;  %290 = vmatpush.msra.mxu0 %v219_v22 }
  0x32   : > { %660 = vmatpush.msra.mxu3 %v235_v23  ;;  %355 = vmatpush.msra.mxu1 %v235_v23 }
  0x33   : > { %645 = vmatpush.msra.mxu2 %v218_v24  ;;  %291 = vmatpush.msra.mxu0 %v218_v24 }
  0x34   : > { %661 = vmatpush.msra.mxu3 %v234_v25  ;;  %356 = vmatpush.msra.mxu1 %v234_v25 }
  0x35   : > { %646 = vmatpush.msra.mxu2 %v217_v26  ;;  %292 = vmatpush.msra.mxu0 %v217_v26 }
  0x36   : > { %662 = vmatpush.msra.mxu3 %v233_v27  ;;  %357 = vmatpush.msra.mxu1 %v233_v27 }
  0x37   : > { %647 = vmatpush.msra.mxu2 %v216_v28  ;;  %293 = vmatpush.msra.mxu0 %v216_v28 }
  0x38   : > { %663 = vmatpush.msra.mxu3 %v232_v29  ;;  %358 = vmatpush.msra.mxu1 %v232_v29 }
  0x39   : > { %648 = vmatpush.msra.mxu2 %v215_v30  ;;  %294 = vmatpush.msra.mxu0 %v215_v30 }
  0x3a   : > { %664 = vmatpush.msra.mxu3 %v231_v31  ;;  %319 = vmatmul.f32.vlgmr.msra.gmra.mxu2 %v263_v32 }
  0x3b   : > { %384 = vmatmul.f32.vlgmr.msra.gmra.mxu3 %v264_v33  ;;  %359 = vmatpush.msra.mxu1 %v231_v31 }
  0x3c   : > { %295 = vmatmul.f32.vlgmr.msra.gmra.mxu0 %v247_v34  ;;  %360 = vmatmul.f32.vlgmr.msra.gmra.mxu1 %v248_v35 }
  0x42   : > { %322 = vmatmul.f32.gmra.mxu2 %v265_v36 }
  0x43   : > { %387 = vmatmul.f32.gmra.mxu3 %v266_v37 }
  0x44   : > { %298 = vmatmul.f32.gmra.mxu0 %v249_v38  ;;  %363 = vmatmul.f32.gmra.mxu1 %v250_v39 }
  0x4a   : > { %325 = vmatmul.f32.gmra.mxu2 %v267_v40 }
  0x4b   : > { %390 = vmatmul.f32.gmra.mxu3 %v268_v41 }
  0x4c   : > { %301 = vmatmul.f32.gmra.mxu0 %v251_v42  ;;  %366 = vmatmul.f32.gmra.mxu1 %v252_v43 }
  0x52   : > { %328 = vmatmul.f32.gmra.mxu2 %v269_v44 }
  0x53   : > { %393 = vmatmul.f32.gmra.mxu3 %v270_v45 }
  0x54   : > { %304 = vmatmul.f32.gmra.mxu0 %v253_v46  ;;  %369 = vmatmul.f32.gmra.mxu1 %v254_v47 }
  0x5a   : > { %331 = vmatmul.f32.gmra.mxu2 %v271_v48 }
  0x5b   : > { %396 = vmatmul.f32.gmra.mxu3 %v272_v49 }
  0x5c   : > { %307 = vmatmul.f32.gmra.mxu0 %v255_v50  ;;  %372 = vmatmul.f32.gmra.mxu1 %v256_v51 }
  0x62   : > { %334 = vmatmul.f32.gmra.mxu2 %v273_v52 }
  0x63   : > { %399 = vmatmul.f32.gmra.mxu3 %v274_v53 }
  0x64   : > { %310 = vmatmul.f32.gmra.mxu0 %v257_v54  ;;  %375 = vmatmul.f32.gmra.mxu1 %v258_v55 }
  0x6a   : > { %337 = vmatmul.f32.gmra.mxu2 %v275_v56 }
  0x6b   : > { %402 = vmatmul.f32.gmra.mxu3 %v276_v57 }
  0x6c   : > { %313 = vmatmul.f32.gmra.mxu0 %v259_v58  ;;  %378 = vmatmul.f32.gmra.mxu1 %v260_v59 }
  0x72   : > { %340 = vmatmul.f32.gmra.mxu2 %v277_v60 }
  0x73   : > { %405 = vmatmul.f32.gmra.mxu3 %v278_v61 }
  0x74   : > { %316 = vmatmul.f32.gmra.mxu0 %v261_v62  ;;  %381 = vmatmul.f32.gmra.mxu1 %v262_v63 }
  0xb9   : > { %v296_v1 = vpop.f32.mrf.mxu0  ;;  %v361_v2 = vpop.f32.mrf.mxu1 }
  0xba   : > { %v362_v3 = vadd.f32 %v361_v2, %v296_v1 }
  0xbc   : > { %v504_v4 = vadd.f32 %v1026_v0, %v362_v3 }
  0xbd   : > { %v320_v5 = vpop.f32.mrf.mxu2 }
  0xbe   : > { %v385_v6 = vpop.f32.mrf.mxu3  ;;  %520 = vst [vmem:[%s1031_s18] sm:$0xff] %v504_v4 }
  0xbf   : > { %v386_v7 = vadd.f32 %v385_v6, %v320_v5 }
  0xc1   : > { %v512_v8 = vadd.f32 %v1026_v0, %v386_v7  ;;  %v299_v9 = vpop.f32.mrf.mxu0  ;;  %v364_v10 = vpop.f32.mrf.mxu1 }
  0xc2   : > { %v365_v11 = vadd.f32 %v364_v10, %v299_v9 }
  0xc3   : > { %528 = vst [vmem:[%s1031_s18 + $0x40] sm:$0xff] %v512_v8 }
  0xc4   : > { %v505_v12 = vadd.f32 %v1026_v0, %v365_v11 }
  0xc5   : > { %v323_v13 = vpop.f32.mrf.mxu2 }
  0xc6   : > { %v388_v14 = vpop.f32.mrf.mxu3  ;;  %521 = vst [vmem:[%s1031_s18 + $0x8] sm:$0xff] %v505_v12 }
  0xc7   : > { %v389_v15 = vadd.f32 %v388_v14, %v323_v13 }
  0xc9   : > { %v513_v16 = vadd.f32 %v1026_v0, %v389_v15  ;;  %v302_v17 = vpop.f32.mrf.mxu0  ;;  %v367_v18 = vpop.f32.mrf.mxu1 }
  0xca   : > { %v368_v19 = vadd.f32 %v367_v18, %v302_v17 }
  0xcb   : > { %529 = vst [vmem:[%s1031_s18 + $0x48] sm:$0xff] %v513_v16 }
  0xcc   : > { %v506_v20 = vadd.f32 %v1026_v0, %v368_v19 }
  0xcd   : > { %v326_v21 = vpop.f32.mrf.mxu2 }
  0xce   : > { %v391_v22 = vpop.f32.mrf.mxu3  ;;  %522 = vst [vmem:[%s1031_s18 + $0x10] sm:$0xff] %v506_v20 }
  0xcf   : > { %v392_v23 = vadd.f32 %v391_v22, %v326_v21 }
  0xd1   : > { %v514_v24 = vadd.f32 %v1026_v0, %v392_v23  ;;  %v305_v25 = vpop.f32.mrf.mxu0  ;;  %v370_v26 = vpop.f32.mrf.mxu1 }
  0xd2   : > { %v371_v27 = vadd.f32 %v370_v26, %v305_v25 }
  0xd3   : > { %530 = vst [vmem:[%s1031_s18 + $0x50] sm:$0xff] %v514_v24 }
  0xd4   : > { %v507_v28 = vadd.f32 %v1026_v0, %v371_v27 }
  0xd5   : > { %v329_v29 = vpop.f32.mrf.mxu2 }
  0xd6   : > { %v394_v30 = vpop.f32.mrf.mxu3  ;;  %523 = vst [vmem:[%s1031_s18 + $0x18] sm:$0xff] %v507_v28 }
  0xd7   : > { %v395_v31 = vadd.f32 %v394_v30, %v329_v29 }
  0xd9   : > { %v515_v32 = vadd.f32 %v1026_v0, %v395_v31  ;;  %v308_v33 = vpop.f32.mrf.mxu0  ;;  %v373_v34 = vpop.f32.mrf.mxu1 }
  0xda   : > { %v374_v35 = vadd.f32 %v373_v34, %v308_v33 }
  0xdb   : > { %531 = vst [vmem:[%s1031_s18 + $0x58] sm:$0xff] %v515_v32 }
  0xdc   : > { %v508_v36 = vadd.f32 %v1026_v0, %v374_v35 }
  0xdd   : > { %v332_v37 = vpop.f32.mrf.mxu2 }
  0xde   : > { %v397_v38 = vpop.f32.mrf.mxu3  ;;  %524 = vst [vmem:[%s1031_s18 + $0x20] sm:$0xff] %v508_v36 }
  0xdf   : > { %v398_v39 = vadd.f32 %v397_v38, %v332_v37 }
  0xe1   : > { %v516_v40 = vadd.f32 %v1026_v0, %v398_v39  ;;  %v311_v41 = vpop.f32.mrf.mxu0  ;;  %v376_v42 = vpop.f32.mrf.mxu1 }
  0xe2   : > { %v377_v43 = vadd.f32 %v376_v42, %v311_v41 }
  0xe3   : > { %532 = vst [vmem:[%s1031_s18 + $0x60] sm:$0xff] %v516_v40 }
  0xe4   : > { %v509_v44 = vadd.f32 %v1026_v0, %v377_v43 }
  0xe5   : > { %v335_v45 = vpop.f32.mrf.mxu2 }
  0xe6   : > { %v400_v46 = vpop.f32.mrf.mxu3  ;;  %525 = vst [vmem:[%s1031_s18 + $0x28] sm:$0xff] %v509_v44 }
  0xe7   : > { %v401_v47 = vadd.f32 %v400_v46, %v335_v45 }
  0xe9   : > { %v517_v48 = vadd.f32 %v1026_v0, %v401_v47  ;;  %v314_v49 = vpop.f32.mrf.mxu0  ;;  %v379_v50 = vpop.f32.mrf.mxu1 }
  0xea   : > { %v380_v51 = vadd.f32 %v379_v50, %v314_v49 }
  0xeb   : > { %533 = vst [vmem:[%s1031_s18 + $0x68] sm:$0xff] %v517_v48 }
  0xec   : > { %v510_v52 = vadd.f32 %v1026_v0, %v380_v51 }
  0xed   : > { %v338_v53 = vpop.f32.mrf.mxu2 }
  0xee   : > { %v403_v54 = vpop.f32.mrf.mxu3  ;;  %526 = vst [vmem:[%s1031_s18 + $0x30] sm:$0xff] %v510_v52 }
  0xef   : > { %v404_v55 = vadd.f32 %v403_v54, %v338_v53 }
  0xf1   : > { %v518_v56 = vadd.f32 %v1026_v0, %v404_v55  ;;  %v317_v57 = vpop.f32.mrf.mxu0  ;;  %v382_v58 = vpop.f32.mrf.mxu1 }
  0xf2   : > { %v383_v59 = vadd.f32 %v382_v58, %v317_v57 }
  0xf3   : > { %534 = vst [vmem:[%s1031_s18 + $0x70] sm:$0xff] %v518_v56 }
  0xf4   : > { %v511_v60 = vadd.f32 %v1026_v0, %v383_v59 }
  0xf5   : > { %v341_v61 = vpop.f32.mrf.mxu2 }
  0xf6   : > { %v406_v62 = vpop.f32.mrf.mxu3  ;;  %527 = vst [vmem:[%s1031_s18 + $0x38] sm:$0xff] %v511_v60 }
  0xf7   : > { %v407_v63 = vadd.f32 %v406_v62, %v341_v61 }
  0xf9   : > { %v519_v1 = vadd.f32 %v1026_v0, %v407_v63 }
  0xfb   : > { %535 = vst [vmem:[%s1031_s18 + $0x78] sm:$0xff] %v519_v1 }
  0xfc PF: > { %s16_s17 = sadd.s32 1, %s803_s17   ;;  %s1089_s12 = smov %s787_s13 }
  0xfd   : > { %p13_p0 = scmp.ge.s32.totalorder %s16_s17, 4   ;;  %s1090_s13 = smov %s791_s14 }
  0xfe   : > { %s1091_s14 = smov %s876_s24  ;;  %s1092_s15 = smov %s799_s16 }
  0xff   : > { %s1093_s16 = smov %s1095_s19  ;;  %15 = sbr.rel (!%p13_p0) target bundleno = 4 (0x4), region = 85 }
 0x104   :  { %558 = vsyncpa [#allocation4], 1 }
 0x105   :  { %560 = vsyncpa [#allocation4 + $0x1], 1 }

</bundles_post_ra>
